<compile_context>
chip_gen: v5e
topology: v5e:2x2
jax: 0.10.0
libtpu: 0.0.40
codegen_flags: <defaults>
</compile_context>

<pallas_src>
import functools
import math

import jax
import jax.numpy as jnp
from jax.experimental import pallas as pl
from jax.experimental.pallas import tpu as pltpu

_LANE = 128  # lane (last-dim) tiling requirement


def _round_up(x: int, m: int) -> int:
    return (x + m - 1) // m * m


def _const_spec(shape):
    """BlockSpec for a grid-invariant (resident) operand, single-buffered."""
    idx = lambda i: (0,) * len(shape)
    try:
        return pl.BlockSpec(shape, idx, pipeline_mode=pl.Buffered(1))
    except Exception:  # older jax without pipeline_mode: fall back to default
        return pl.BlockSpec(shape, idx)


def _vmem_limit_bytes(need_bytes: int) -> int:
    """Requested scoped-VMEM: actual need + margin, capped below physical."""
    limit = int(need_bytes * 1.5) + (4 << 20)
    limit = max(limit, 16 << 20)
    cap = 48 << 20  # conservative default: fits inside v7x's 64 MiB physical
    try:
        info = pltpu.get_tpu_info()
        phys = getattr(info, "vmem_capacity_bytes", None)
        if phys:
            cap = int(phys * 3) // 4
    except Exception:
        pass
    return min(limit, cap)


def _mlp_kernel(x_ref, w1_ref, b1_ref, w2_ref, b2_ref, o_ref, *, compute_dtype):
    # In-kernel cast of the activation tile (VPU, hidden under the MXU).
    x = x_ref[...].astype(compute_dtype)
    # First linear (MXU, f32 accumulate) + bias + ReLU epilogue in f32.
    h = jnp.dot(x, w1_ref[...], preferred_element_type=jnp.float32)
    h = jnp.maximum(h + b1_ref[...], 0.0)          # b1 is (1, mid_p) -> broadcast
    # TODO(synk): dropout with dropout_r > 0 (training mode) not implemented;
    # default dropout_r=0.0 makes it the identity, matching eval semantics.

    # Second linear: cast activations back to the compute dtype for the MXU.
    y = jnp.dot(h.astype(compute_dtype), w2_ref[...],
                preferred_element_type=jnp.float32)
    o_ref[...] = (y + b2_ref[...]).astype(o_ref.dtype)


def prepare_mlp_params(w1, b1, w2, b2, *, compute_dtype=jnp.bfloat16):
    """One-time weight prep (cast + mid-dim pad), hoisted out of the forward path.

    Weights are stored (in, out), i.e. already transposed from PyTorch's
    (out, in) nn.Linear layout, so the kernel does plain x @ W.
    """
    in_size, mid_size = w1.shape
    out_size = w2.shape[1]
    # Pad the hidden (mid) dim to a lane multiple: zero columns of W1 / zero
    # entries of b1 give h-padding == relu(0) == 0, and the zero rows of W2
    # contribute nothing, so the math is exact.
    mid_p = _round_up(mid_size, _LANE)
    w1p = jnp.pad(w1.astype(compute_dtype), ((0, 0), (0, mid_p - mid_size)))
    w2p = jnp.pad(w2.astype(compute_dtype), ((0, mid_p - mid_size), (0, 0)))
    b1p = jnp.pad(b1.astype(jnp.float32), (0, mid_p - mid_size)).reshape(1, mid_p)
    b2p = b2.astype(jnp.float32).reshape(1, out_size)
    return dict(w1=w1p, b1=b1p, w2=w2p, b2=b2p,
                in_size=in_size, mid_size=mid_size, out_size=out_size,
                compute_dtype=compute_dtype)


def mlp_forward(x, params, *, row_tile=512, out_dtype=None):
    """x: (..., in_size); params: output of prepare_mlp_params."""
    in_size = params["in_size"]
    out_size = params["out_size"]
    compute_dtype = params["compute_dtype"]
    w1p, b1p, w2p, b2p = params["w1"], params["b1"], params["w2"], params["b2"]
    mid_p = w1p.shape[1]
    assert x.shape[-1] == in_size, "last dim of x must equal in_size"

    lead = x.shape[:-1]
    M = math.prod(lead) if lead else 1
    out_dtype = x.dtype if out_dtype is None else out_dtype
    x2 = x.reshape(M, in_size)            # no pad, no cast: view-only reshape

    # Row tile: large (~512 rows) for HBM-roofline efficiency, multiple of 16;
    # ensure >= 2 grid steps when possible so the "parallel" axis can split
    # across v7x's two TensorCores.  A full-extent block is used when M is tiny.
    row_tile = max(16, _round_up(row_tile, 16))
    tm = min(row_tile, _round_up(pl.cdiv(M, 2), 16))
    if tm >= M:
        tm = M                            # single block == full dim, always legal
    grid = (pl.cdiv(M, tm),)

    # VMEM budget (per the hardware model): double-buffered x/out tiles,
    # single-buffered resident weights, f32 h intermediate + in-kernel casts.
    xb = jnp.dtype(x.dtype).itemsize
    ob = jnp.dtype(out_dtype).itemsize
    cb = jnp.dtype(compute_dtype).itemsize
    need = (2 * tm * in_size * xb                   # x tile (double buffered)
            + 2 * tm * out_size * ob                # out tile (double buffered)
            + (in_size + out_size) * mid_p * cb     # W1 + W2 (single buffered)
            + (mid_p + out_size) * 4                # biases (f32)
            + tm * mid_p * 4                        # f32 h intermediate
            + tm * (in_size + mid_p) * cb)          # bf16 casts of x and h
    vmem_limit = _vmem_limit_bytes(need)

    kernel = functools.partial(_mlp_kernel, compute_dtype=compute_dtype)

    out2 = pl.pallas_call(
        kernel,
        out_shape=jax.ShapeDtypeStruct((M, out_size), out_dtype),
        grid_spec=pltpu.PrefetchScalarGridSpec(
            num_scalar_prefetch=0,
            grid=grid,
            in_specs=[
                pl.BlockSpec((tm, in_size), lambda i: (i, 0)),  # x row tile (pipelined)
                _const_spec((in_size, mid_p)),                   # W1 (resident, 1 buf)
                _const_spec((1, mid_p)),                         # b1
                _const_spec((mid_p, out_size)),                  # W2 (resident, 1 buf)
                _const_spec((1, out_size)),                      # b2
            ],
            out_specs=pl.BlockSpec((tm, out_size), lambda i: (i, 0)),
        ),
        compiler_params=pltpu.CompilerParams(
            dimension_semantics=("parallel",),   # row axis -> megacore split (v7x)
            vmem_limit_bytes=vmem_limit,
        ),
    )(x2, w1p, b1p, w2p, b2p)

    return out2.reshape(*lead, out_size)


if __name__ == "__main__":
    # Small shapes consistent with the module: x of shape (batch, seq, in_size).
    # M = batch*seq = 400 exercises multi-block tiling (tm=208, grid=2) and a
    # partial edge block; mid=64 exercises the hidden-dim lane padding.
    batch, seq = 2, 200
    in_size, mid_size, out_size = 32, 64, 32

    key = jax.random.PRNGKey(0)
    kx, kw1, kb1, kw2, kb2 = jax.random.split(key, 5)

    x = jax.random.normal(kx, (batch, seq, in_size), dtype=jnp.float32)

    # Deterministic parameter init (mimics nn.Linear uniform(-1/sqrt(fan_in), .)).
    lim1 = 1.0 / (in_size ** 0.5)
    lim2 = 1.0 / (mid_size ** 0.5)
    # Stored already transposed to (in, out) layout for the kernel.
    w1 = jax.random.uniform(kw1, (in_size, mid_size), jnp.float32, -lim1, lim1)
    b1 = jax.random.uniform(kb1, (mid_size,), jnp.float32, -lim1, lim1)
    w2 = jax.random.uniform(kw2, (mid_size, out_size), jnp.float32, -lim2, lim2)
    b2 = jax.random.uniform(kb2, (out_size,), jnp.float32, -lim2, lim2)

    # One-time parameter prep (cast + pad), hoisted out of the per-call path.
    params = prepare_mlp_params(w1, b1, w2, b2)

    y = jax.block_until_ready(mlp_forward(x, params))
    assert y.shape == (batch, seq, out_size)

    # Reference 1: plain JAX with the same bf16-operand / f32-accumulate recipe.
    xb = x.reshape(-1, in_size).astype(jnp.bfloat16)
    w1b = w1.astype(jnp.bfloat16)
    w2b = w2.astype(jnp.bfloat16)
    h = jnp.maximum(jnp.dot(xb, w1b, preferred_element_type=jnp.float32) + b1, 0.0)
    ref_bf16 = (jnp.dot(h.astype(jnp.bfloat16), w2b,
                        preferred_element_type=jnp.float32) + b2
                ).reshape(batch, seq, out_size)
    assert jnp.allclose(y, ref_bf16, atol=2e-2, rtol=2e-2), "mismatch vs bf16 reference"

    # Reference 2: pure f32 math (PyTorch module semantics), looser tolerance
    # since the kernel uses bf16 matmul operands.
    ref_f32 = jnp.maximum(x @ w1 + b1, 0.0) @ w2 + b2
    assert jnp.allclose(y, ref_f32, atol=5e-2, rtol=5e-2), "mismatch vs f32 reference"

    print("KERNEL_OK")
</pallas_src>

<mosaic_0001>
module attributes {stable_mosaic.version = 11 : i64} {
  func.func @_mlp_kernel(%arg0: i32, %arg1: memref<208x32xf32, #tpu.memory_space<vmem>>, %arg2: memref<32x128xbf16, #tpu.memory_space<vmem>>, %arg3: memref<1x128xf32, #tpu.memory_space<vmem>>, %arg4: memref<128x32xbf16, #tpu.memory_space<vmem>>, %arg5: memref<1x32xf32, #tpu.memory_space<vmem>>, %arg6: memref<208x32xf32, #tpu.memory_space<vmem>>) attributes {dimension_semantics = [#tpu.dimension_semantics<parallel>], iteration_bounds = array<i64: 2>, scalar_prefetch = 0 : i64, scratch_operands = 0 : i64, tpu.core_type = #tpu.core_type<tc>, window_params = [{transform_indices = @transform_0, window_bounds = array<i64: 208, 32>}, {pipeline_mode = #tpu.pipeline_mode<synchronous>, transform_indices = @transform_1, window_bounds = array<i64: 32, 128>}, {pipeline_mode = #tpu.pipeline_mode<synchronous>, transform_indices = @transform_2, window_bounds = array<i64: 1, 128>}, {pipeline_mode = #tpu.pipeline_mode<synchronous>, transform_indices = @transform_3, window_bounds = array<i64: 128, 32>}, {pipeline_mode = #tpu.pipeline_mode<synchronous>, transform_indices = @transform_4, window_bounds = array<i64: 1, 32>}, {transform_indices = @transform_5, window_bounds = array<i64: 208, 32>}]} {
    %c0 = arith.constant 0 : index
    %c0_0 = arith.constant 0 : index
    %0 = vector.load %arg1[%c0, %c0_0] : memref<208x32xf32, #tpu.memory_space<vmem>>, vector<208x32xf32>
    %1 = arith.truncf %0 : vector<208x32xf32> to vector<208x32xbf16>
    %c0_1 = arith.constant 0 : index
    %c0_2 = arith.constant 0 : index
    %2 = vector.load %arg2[%c0_1, %c0_2] : memref<32x128xbf16, #tpu.memory_space<vmem>>, vector<32x128xbf16>
    %cst = arith.constant dense<0.000000e+00> : vector<208x128xf32>
    %3 = tpu.matmul %1, %2, %cst {dimension_numbers = #tpu.dot_dimension_numbers<[1], [0], [0], [1], [0, 0, 1, 1], [], []>} : vector<208x32xbf16>, vector<32x128xbf16>, vector<208x128xf32> -> vector<208x128xf32>
    %c0_3 = arith.constant 0 : index
    %c0_4 = arith.constant 0 : index
    %4 = vector.load %arg3[%c0_3, %c0_4] : memref<1x128xf32, #tpu.memory_space<vmem>>, vector<1x128xf32>
    %5 = vector.broadcast %4 : vector<1x128xf32> to vector<208x128xf32>
    %6 = arith.addf %3, %5 : vector<208x128xf32>
    %cst_5 = arith.constant 0.000000e+00 : f32
    %7 = vector.broadcast %cst_5 : f32 to vector<208x128xf32>
    %8 = arith.maximumf %6, %7 : vector<208x128xf32>
    %9 = arith.truncf %8 : vector<208x128xf32> to vector<208x128xbf16>
    %c0_6 = arith.constant 0 : index
    %c0_7 = arith.constant 0 : index
    %10 = vector.load %arg4[%c0_6, %c0_7] : memref<128x32xbf16, #tpu.memory_space<vmem>>, vector<128x32xbf16>
    %cst_8 = arith.constant dense<0.000000e+00> : vector<208x32xf32>
    %11 = tpu.matmul %9, %10, %cst_8 {dimension_numbers = #tpu.dot_dimension_numbers<[1], [0], [0], [1], [0, 0, 1, 1], [], []>} : vector<208x128xbf16>, vector<128x32xbf16>, vector<208x32xf32> -> vector<208x32xf32>
    %c0_9 = arith.constant 0 : index
    %c0_10 = arith.constant 0 : index
    %12 = vector.load %arg5[%c0_9, %c0_10] : memref<1x32xf32, #tpu.memory_space<vmem>>, vector<1x32xf32>
    %13 = vector.broadcast %12 : vector<1x32xf32> to vector<208x32xf32>
    %14 = arith.addf %11, %13 : vector<208x32xf32>
    %c0_11 = arith.constant 0 : index
    %c0_12 = arith.constant 0 : index
    %15 = vector.load %arg6[%c0_11, %c0_12] : memref<208x32xf32, #tpu.memory_space<vmem>>, vector<208x32xf32>
    tpu.vector_store %arg6[%c0_11, %c0_12], %14 {strides = array<i32>} : memref<208x32xf32, #tpu.memory_space<vmem>>, vector<208x32xf32>,
    return
  }
  func.func @transform_0(%arg0: i32) -> (i32, i32) {
    %c0_i32 = arith.constant 0 : i32
    %c0_i32_0 = arith.constant 0 : i32
    return %arg0, %c0_i32 : i32, i32
  }
  func.func @transform_1(%arg0: i32) -> (i32, i32) {
    %c0_i32 = arith.constant 0 : i32
    %c0_i32_0 = arith.constant 0 : i32
    %c0_i32_1 = arith.constant 0 : i32
    return %c0_i32, %c0_i32_0 : i32, i32
  }
  func.func @transform_2(%arg0: i32) -> (i32, i32) {
    %c0_i32 = arith.constant 0 : i32
    %c0_i32_0 = arith.constant 0 : i32
    %c0_i32_1 = arith.constant 0 : i32
    return %c0_i32, %c0_i32_0 : i32, i32
  }
  func.func @transform_3(%arg0: i32) -> (i32, i32) {
    %c0_i32 = arith.constant 0 : i32
    %c0_i32_0 = arith.constant 0 : i32
    %c0_i32_1 = arith.constant 0 : i32
    return %c0_i32, %c0_i32_0 : i32, i32
  }
  func.func @transform_4(%arg0: i32) -> (i32, i32) {
    %c0_i32 = arith.constant 0 : i32
    %c0_i32_0 = arith.constant 0 : i32
    %c0_i32_1 = arith.constant 0 : i32
    return %c0_i32, %c0_i32_0 : i32, i32
  }
  func.func @transform_5(%arg0: i32) -> (i32, i32) {
    %c0_i32 = arith.constant 0 : i32
    %c0_i32_0 = arith.constant 0 : i32
    return %arg0, %c0_i32 : i32, i32
  }
}

</mosaic_0001>

<bundles_post_ra>
// kernel: tpu_custom_call.1
= control target key start
LH: loop header
LB: loop body
LE: loop exit
PB: predicated region body
PF: predicated region fallthrough
CT: control target
= control target key end

     0   :  { %s1260_s18 = smov 0   ;;  %s1262_s19 = smov 0   ;;  %s1614_s0 = inlined_call_operand.vmem [shape: f32[400,32], index: 0, kind: input, shape index: {}]   ;;  %s1615_s1 = inlined_call_operand.vmem [shape: bf16[32,128], index: 1, kind: input, shape index: {}]   ;;  %s1616_s2 = inlined_call_operand.vmem [shape: f32[1,128], index: 2, kind: input, shape index: {}]   ;;  %s1617_s3 = inlined_call_operand.vmem [shape: bf16[128,32], index: 3, kind: input, shape index: {}]   ;;  %s1618_s4 = inlined_call_operand.vmem [shape: f32[1,32], index: 4, kind: input, shape index: {}]   ;;  %s1619_s5 = inlined_call_operand.vmem [shape: f32[400,32], index: 5, kind: output, shape index: {}]  }
   0x1   :  { %s1264_s20 = smov 0  }
   0x2 LB: > { %s1273_s21 = sadd.s32 4294967295, %s1196_s20   ;;  %s1275_s22 = sadd.s32 1, %s1196_s20   ;;  %s1196_s20 = sphi %s1264_s20, %s1628_s20   ;;  %s1192_s19 = sphi %s1262_s19, %s1627_s19   ;;  %s1188_s18 = sphi %s1260_s18, %s1626_s18  }
   0x3   : > { %s129_s23 = ssub.s32 %s1196_s20, %s1275_s22  ;;  %s132_s24 = sadd.s32 1, %s1192_s19 }
   0x4   : > { %p130_p0 = scmp.eq.s32.totalorder %s129_s23, 0  ;;  %p142_p1 = scmp.ne.s32.totalorder %s1192_s19, %s1188_s18 }
   0x5   : > { %p143_p2 = scmp.eq.s32.totalorder %s1273_s21, 1  ;;  %p948_p3 = scmp.ge.s32.totalorder %s1196_s20, 1 }
   0x6   : > { %s1283_s25 = scalar_select %p130_p0, %s1192_s19, %s132_s24  }
   0x7   : > { %p1285_p4 = por %p143_p2, %p142_p1  ;;  %p196_p5 = scmp.lt.s32.totalorder %s1196_s20, 3 }
   0x9   : > { %p197_p6 = pnand %p948_p3, %p196_p5 }
   0xa   : > { %s1293_s29 = smul.u32 (!%p197_p6), 26, %s1273_s21 }
   0xb   : > { %200 = sbr.rel (%p197_p6) target bundleno = 556 (0x22c), region = 40 }
   0xc   : > { %p232_p7 = scmp.lt.s32.totalorder (!%p197_p6), %s1293_s29, 49 }
  0x10   : > { %v1016_v0 = vld [vmem:[%s1615_s1 + $0x8] sm:$0xff]  ;;  %v1015_v1 = vld [vmem:[%s1615_s1] sm:$0xff]  ;;  %s233_s7 = scalar_select %p232_p7, %s1293_s29, 49  ;;  %vm306_vm0 = vcmask 261120   ;;  %v1024_v22 = vld [vmem:[%s1617_s3 + $0x38] sm:$0xff] }
  0x11   : > { %352 = vmatpush.bf16.msra.mxu0 %v1016_v0  ;;  %1026 = vmatpush.bf16.msra.mxu3 %v1016_v0  ;;  %v1023_v27 = vld [vmem:[%s1617_s3 + $0x30] sm:$0xff]  ;;  %v1022_v29 = vld [vmem:[%s1617_s3 + $0x28] sm:$0xff]  ;;  %v1021_v32 = vld [vmem:[%s1617_s3 + $0x20] sm:$0xff]  ;;  %s1025_s17 = smul.u32 (%p1285_p4), 208, %s1273_s21 }
  0x12   : > { %s949_s8 = sshll.u32 %s233_s7, 3  ;;  %527 = vmatpush.bf16.msra.mxu1 %v1024_v22  ;;  %1028 = vmatpush.bf16.msra.mxu2 %v1024_v22  ;;  %v1020_v35 = vld [vmem:[%s1617_s3 + $0x18] sm:$0xff]  ;;  %v1019_v37 = vld [vmem:[%s1617_s3 + $0x10] sm:$0xff]  ;;  %v1018_v38 = vld [vmem:[%s1617_s3 + $0x8] sm:$0xff] }
  0x13   : > { %s1303_s11 = scalar_lea.vmem %s1614_s0, %s949_s8  ;;  %v1017_v39 = vld [vmem:[%s1617_s3] sm:$0xff]  ;;  %s1492_s24 = scalar_lea.vmem (%p1285_p4), %s1619_s5, %s1025_s17  }
  0x14   : > { %v247_v2 = vld [vmem:[%s1303_s11] sm:$0xff]  ;;  %v248_v3 = vld [vmem:[%s1303_s11 + $0x8] sm:$0xff]  ;;  %v249_v5 = vld [vmem:[%s1303_s11 + $0x10] sm:$0xff] }
  0x15   : > { %353 = vmatpush.bf16.msra.mxu0 %v1015_v1  ;;  %1027 = vmatpush.bf16.msra.mxu3 %v1015_v1  ;;  %v273_v4 = vpack.c.bf16 %v248_v3, %v247_v2  ;;  %v250_v6 = vld [vmem:[%s1303_s11 + $0x18] sm:$0xff]  ;;  %v251_v8 = vld [vmem:[%s1303_s11 + $0x20] sm:$0xff]  ;;  %v252_v9 = vld [vmem:[%s1303_s11 + $0x28] sm:$0xff] }
  0x16   : > { %v274_v7 = vpack.c.bf16 %v250_v6, %v249_v5  ;;  %v275_v10 = vpack.c.bf16 %v252_v9, %v251_v8  ;;  %v253_v11 = vld [vmem:[%s1303_s11 + $0x30] sm:$0xff]  ;;  %v254_v12 = vld [vmem:[%s1303_s11 + $0x38] sm:$0xff]  ;;  %v263_v14 = vld [vmem:[%s1303_s11 + $0x80] sm:$0xff]  ;;  %528 = vmatpush.bf16.msra.mxu1 %v1023_v27  ;;  %1030 = vmatpush.bf16.msra.mxu2 %v1023_v27 }
  0x17   : > { %v276_v13 = vpack.c.bf16 %v254_v12, %v253_v11  ;;  %v264_v15 = vld [vmem:[%s1303_s11 + $0x88] sm:$0xff]  ;;  %v255_v17 = vld [vmem:[%s1303_s11 + $0x40] sm:$0xff]  ;;  %v265_v20 = vld [vmem:[%s1303_s11 + $0x90] sm:$0xff] }
  0x18   : > { %958 = vmatmul.msk.bf16.vlgmr.msra.gmra.mxu0 %vm306_vm0, %v273_v4  ;;  %v281_v16 = vpack.c.bf16 %v264_v15, %v263_v14  ;;  %v256_v18 = vld [vmem:[%s1303_s11 + $0x48] sm:$0xff]  ;;  %v266_v21 = vld [vmem:[%s1303_s11 + $0x98] sm:$0xff]  ;;  %v257_v24 = vld [vmem:[%s1303_s11 + $0x50] sm:$0xff] }
  0x19   : > { %v277_v19 = vpack.c.bf16 %v256_v18, %v255_v17  ;;  %v282_v23 = vpack.c.bf16 %v266_v21, %v265_v20  ;;  %1029 = vmatpush.bf16.msrb.mxu3 %v1024_v22  ;;  %v258_v25 = vld [vmem:[%s1303_s11 + $0x58] sm:$0xff]  ;;  %v267_v28 = vld [vmem:[%s1303_s11 + $0xa0] sm:$0xff]  ;;  %v268_v30 = vld [vmem:[%s1303_s11 + $0xa8] sm:$0xff] }
  0x1a   : > { %966 = vmatmul.msk.bf16.vlgmr.msra.gmra.mxu3 %vm306_vm0, %v281_v16  ;;  %v278_v26 = vpack.c.bf16 %v258_v25, %v257_v24  ;;  %v283_v31 = vpack.c.bf16 %v268_v30, %v267_v28  ;;  %529 = vmatpush.bf16.msra.mxu1 %v1022_v29  ;;  %v259_v33 = vld [vmem:[%s1303_s11 + $0x60] sm:$0xff]  ;;  %v260_v34 = vld [vmem:[%s1303_s11 + $0x68] sm:$0xff]  ;;  %v269_v40 = vld [vmem:[%s1303_s11 + $0xb0] sm:$0xff] }
  0x1b   : > { %1032 = vmatpush.bf16.msra.mxu2 %v1022_v29  ;;  %v279_v36 = vpack.c.bf16 %v260_v34, %v259_v33  ;;  %v270_v41 = vld [vmem:[%s1303_s11 + $0xb8] sm:$0xff]  ;;  %v261_v43 = vld [vmem:[%s1303_s11 + $0x70] sm:$0xff]  ;;  %v271_v46 = vld [vmem:[%s1303_s11 + $0xc0] sm:$0xff] }
  0x1c   : > { %v284_v42 = vpack.c.bf16 %v270_v41, %v269_v40  ;;  %v262_v44 = vld [vmem:[%s1303_s11 + $0x78] sm:$0xff]  ;;  %v272_v47 = vld [vmem:[%s1303_s11 + $0xc8] sm:$0xff]  ;;  %v1371_v50 = vld [vmem:[%s1616_s2] ss:$0 sm:$0xff]  ;;  %s224_s11 = sand.u32 1, %s1188_s18   ;;  %s635_s18 = ssub.s32 (%p1285_p4), 50, %s1293_s29 }
  0x1d   : > { %1031 = vmatpush.bf16.msrb.mxu3 %v1023_v27  ;;  %v280_v45 = vpack.c.bf16 %v262_v44, %v261_v43  ;;  %v285_v48 = vpack.c.bf16 %v272_v47, %v271_v46  ;;  %s1044_s13 = smul.u32 208, %s224_s11  ;;  %p636_p8 = scmp.lt.s32.totalorder (%p1285_p4), %s635_s18, 26 }
  0x1e   : > { %530 = vmatpush.bf16.msra.mxu1 %v1021_v32 }
  0x1f   : > { %1034 = vmatpush.bf16.msra.mxu2 %v1021_v32  ;;  %s1406_s16 = scalar_lea.vmem [#allocation2], %s1044_s13  }
  0x21   : > { %1033 = vmatpush.bf16.msrb.mxu3 %v1022_v29 }
  0x22   : > { %531 = vmatpush.bf16.msra.mxu1 %v1020_v35 }
  0x23   : > { %1036 = vmatpush.bf16.msra.mxu2 %v1020_v35 }
  0x25   : > { %1035 = vmatpush.bf16.msrb.mxu3 %v1021_v32 }
  0x26   : > { %532 = vmatpush.bf16.msra.mxu1 %v1019_v37 }
  0x27   : > { %1038 = vmatpush.bf16.msra.mxu2 %v1019_v37 }
  0x28   : > { %959 = vmatmul.msk.bf16.gmra.mxu0 %vm306_vm0, %v274_v7 }
  0x29   : > { %1037 = vmatpush.bf16.msrb.mxu3 %v1020_v35 }
  0x2a   : > { %967 = vmatmul.msk.bf16.gmra.mxu3 %vm306_vm0, %v282_v23  ;;  %533 = vmatpush.bf16.msra.mxu1 %v1018_v38 }
  0x2b   : > { %1040 = vmatpush.bf16.msra.mxu2 %v1018_v38 }
  0x2d   : > { %1039 = vmatpush.bf16.msrb.mxu3 %v1019_v37 }
  0x2e   : > { %534 = vmatpush.bf16.msra.mxu1 %v1017_v39 }
  0x2f   : > { %1042 = vmatpush.bf16.msra.mxu2 %v1017_v39 }
  0x31   : > { %1041 = vmatpush.bf16.msrb.mxu3 %v1018_v38 }
  0x35   : > { %1043 = vmatpush.bf16.msrb.mxu3 %v1017_v39 }
  0x38   : > { %960 = vmatmul.msk.bf16.gmra.mxu0 %vm306_vm0, %v275_v10 }
  0x3a   : > { %968 = vmatmul.msk.bf16.gmra.mxu3 %vm306_vm0, %v283_v31 }
  0x48   : > { %961 = vmatmul.msk.bf16.gmra.mxu0 %vm306_vm0, %v276_v13 }
  0x4a   : > { %969 = vmatmul.msk.bf16.gmra.mxu3 %vm306_vm0, %v284_v42 }
  0x58   : > { %962 = vmatmul.msk.bf16.gmra.mxu0 %vm306_vm0, %v277_v19 }
  0x5a   : > { %970 = vmatmul.msk.bf16.gmra.mxu3 %vm306_vm0, %v285_v48 }
  0x68   : > { %963 = vmatmul.msk.bf16.gmra.mxu0 %vm306_vm0, %v278_v26 }
  0x78   : > { %964 = vmatmul.msk.bf16.gmra.mxu0 %vm306_vm0, %v279_v36 }
  0x88   : > { %965 = vmatmul.msk.bf16.gmra.mxu0 %vm306_vm0, %v280_v45 }
  0x95   : > { %v355_v49 = vpop.f32.mrf.mxu0 }
  0x96   : > { %v356_v51 = vadd.f32 %v1371_v50, %v355_v49 }
  0x98   : > { %v420_v54 = vmax.f32 %v356_v51, 0.0 }
  0x9d   : > { %v357_v52 = vpop.f32.mrf.mxu0  ;;  %v395_v15 = vpop.f32.mrf.mxu3 }
  0x9e   : > { %v358_v53 = vadd.f32 %v1371_v50, %v357_v52  ;;  %v396_v23 = vadd.f32 %v1371_v50, %v395_v15 }
  0xa0   : > { %v421_v55 = vmax.f32 %v358_v53, 0.0  ;;  %v436_v27 = vmax.f32 %v396_v23, 0.0 }
  0xa2   : > { %v446_v56 = vpack.c.bf16 %v421_v55, %v420_v54 }
  0xa4   : > { %535 = vmatmul.bf16.vlgmr.msra.gmra.mxu1 %v446_v56 }
  0xa5   : > { %v360_v57 = vpop.f32.mrf.mxu0  ;;  %v397_v18 = vpop.f32.mrf.mxu3 }
  0xa6   : > { %v361_v58 = vadd.f32 %v1371_v50, %v360_v57  ;;  %v398_v24 = vadd.f32 %v1371_v50, %v397_v18 }
  0xa8   : > { %v422_v61 = vmax.f32 %v361_v58, 0.0  ;;  %v437_v28 = vmax.f32 %v398_v24, 0.0 }
  0xaa   : > { %v454_v29 = vpack.c.bf16 %v437_v28, %v436_v27 }
  0xad   : > { %v362_v59 = vpop.f32.mrf.mxu0  ;;  %v400_v26 = vpop.f32.mrf.mxu3 }
  0xae   : > { %v363_v60 = vadd.f32 %v1371_v50, %v362_v59  ;;  %v401_v37 = vadd.f32 %v1371_v50, %v400_v26 }
  0xb0   : > { %v423_v62 = vmax.f32 %v363_v60, 0.0  ;;  %v438_v41 = vmax.f32 %v401_v37, 0.0 }
  0xb2   : > { %v447_v63 = vpack.c.bf16 %v423_v62, %v422_v61 }
  0xb4   : > { %540 = vmatmul.bf16.gmra.mxu1 %v447_v63 }
  0xb5   : > { %v365_v0 = vpop.f32.mrf.mxu0  ;;  %v402_v32 = vpop.f32.mrf.mxu3 }
  0xb6   : > { %v366_v1 = vadd.f32 %v1371_v50, %v365_v0  ;;  %v403_v38 = vadd.f32 %v1371_v50, %v402_v32 }
  0xb8   : > { %v424_v4 = vmax.f32 %v366_v1, 0.0  ;;  %v439_v42 = vmax.f32 %v403_v38, 0.0 }
  0xba   : > { %v455_v43 = vpack.c.bf16 %v439_v42, %v438_v41 }
  0xbd   : > { %v367_v2 = vpop.f32.mrf.mxu0  ;;  %v405_v40 = vpop.f32.mrf.mxu3 }
  0xbe   : > { %v368_v3 = vadd.f32 %v1371_v50, %v367_v2  ;;  %v406_v52 = vadd.f32 %v1371_v50, %v405_v40 }
  0xc0   : > { %v425_v5 = vmax.f32 %v368_v3, 0.0  ;;  %v440_v56 = vmax.f32 %v406_v52, 0.0 }
  0xc2   : > { %v448_v6 = vpack.c.bf16 %v425_v5, %v424_v4 }
  0xc4   : > { %545 = vmatmul.bf16.gmra.mxu1 %v448_v6 }
  0xc5   : > { %v370_v7 = vpop.f32.mrf.mxu0  ;;  %v407_v46 = vpop.f32.mrf.mxu3 }
  0xc6   : > { %v371_v8 = vadd.f32 %v1371_v50, %v370_v7  ;;  %v408_v53 = vadd.f32 %v1371_v50, %v407_v46 }
  0xc8   : > { %v426_v11 = vmax.f32 %v371_v8, 0.0  ;;  %v441_v57 = vmax.f32 %v408_v53, 0.0 }
  0xca   : > { %v456_v58 = vpack.c.bf16 %v441_v57, %v440_v56 }
  0xcd   : > { %v372_v9 = vpop.f32.mrf.mxu0  ;;  %v410_v55 = vpop.f32.mrf.mxu3 }
  0xce   : > { %v373_v10 = vadd.f32 %v1371_v50, %v372_v9  ;;  %v411_v2 = vadd.f32 %v1371_v50, %v410_v55 }
  0xd0   : > { %v427_v12 = vmax.f32 %v373_v10, 0.0  ;;  %v442_v5 = vmax.f32 %v411_v2, 0.0  ;;  %v1402_v10 = vld [vmem:[%s1618_s4] ss:$0 sm:$0xff] }
  0xd2   : > { %v449_v13 = vpack.c.bf16 %v427_v12, %v426_v11 }
  0xd4   : > { %550 = vmatmul.bf16.gmra.mxu1 %v449_v13 }
  0xd5   : > { %v375_v14 = vpop.f32.mrf.mxu0  ;;  %v412_v61 = vpop.f32.mrf.mxu3 }
  0xd6   : > { %v376_v16 = vadd.f32 %v1371_v50, %v375_v14  ;;  %v413_v3 = vadd.f32 %v1371_v50, %v412_v61 }
  0xd8   : > { %v428_v20 = vmax.f32 %v376_v16, 0.0  ;;  %v443_v6 = vmax.f32 %v413_v3, 0.0 }
  0xda   : > { %v457_v8 = vpack.c.bf16 %v443_v6, %v442_v5 }
  0xdd   : > { %v377_v17 = vpop.f32.mrf.mxu0  ;;  %v415_v4 = vpop.f32.mrf.mxu3 }
  0xde   : > { %v378_v19 = vadd.f32 %v1371_v50, %v377_v17  ;;  %v416_v7 = vadd.f32 %v1371_v50, %v415_v4 }
  0xe0   : > { %v429_v21 = vmax.f32 %v378_v19, 0.0  ;;  %v444_v11 = vmax.f32 %v416_v7, 0.0 }
  0xe2   : > { %v450_v22 = vpack.c.bf16 %v429_v21, %v428_v20 }
  0xe4   : > { %555 = vmatmul.bf16.gmra.mxu1 %v450_v22 }
  0xe5   : > { %v380_v25 = vpop.f32.mrf.mxu0  ;;  %v417_v9 = vpop.f32.mrf.mxu3 }
  0xe6   : > { %v381_v30 = vadd.f32 %v1371_v50, %v380_v25  ;;  %v418_v12 = vadd.f32 %v1371_v50, %v417_v9 }
  0xe8   : > { %v430_v34 = vmax.f32 %v381_v30, 0.0  ;;  %v445_v13 = vmax.f32 %v418_v12, 0.0 }
  0xea   : > { %v458_v16 = vpack.c.bf16 %v445_v13, %v444_v11 }
  0xec   : > { %595 = vmatmul.bf16.vlgmr.msrb.gmra.mxu3 %v458_v16 }
  0xed   : > { %v382_v31 = vpop.f32.mrf.mxu0 }
  0xee   : > { %v383_v33 = vadd.f32 %v1371_v50, %v382_v31 }
  0xf0   : > { %v431_v35 = vmax.f32 %v383_v33, 0.0 }
  0xf2   : > { %v451_v36 = vpack.c.bf16 %v431_v35, %v430_v34 }
  0xf4   : > { %560 = vmatmul.bf16.gmra.mxu1 %v451_v36 }
  0xf5   : > { %v385_v39 = vpop.f32.mrf.mxu0 }
  0xf6   : > { %v386_v44 = vadd.f32 %v1371_v50, %v385_v39 }
  0xf8   : > { %v432_v48 = vmax.f32 %v386_v44, 0.0 }
  0xfd   : > { %v387_v45 = vpop.f32.mrf.mxu0 }
  0xfe   : > { %v388_v47 = vadd.f32 %v1371_v50, %v387_v45 }
 0x100   : > { %v433_v49 = vmax.f32 %v388_v47, 0.0 }
 0x102   : > { %v452_v51 = vpack.c.bf16 %v433_v49, %v432_v48 }
 0x104   : > { %565 = vmatmul.bf16.vlgmr.msra.gmra.mxu2 %v452_v51 }
 0x105   : > { %v390_v54 = vpop.f32.mrf.mxu0 }
 0x106   : > { %v391_v59 = vadd.f32 %v1371_v50, %v390_v54 }
 0x108   : > { %v434_v63 = vmax.f32 %v391_v59, 0.0 }
 0x10d   : > { %v392_v60 = vpop.f32.mrf.mxu0 }
 0x10e   : > { %v393_v62 = vadd.f32 %v1371_v50, %v392_v60 }
 0x110   : > { %v435_v0 = vmax.f32 %v393_v62, 0.0 }
 0x112   : > { %v453_v1 = vpack.c.bf16 %v435_v0, %v434_v63 }
 0x114   : > { %570 = vmatmul.bf16.gmra.mxu2 %v453_v1 }
 0x121   : > { %v536_v14 = vpop.f32.mrf.mxu1 }
 0x122   : > { %v537_v15 = vadd.f32 %v1402_v10, %v536_v14 }
 0x124   : > { %601 = vst.msk [vmem:[%s1406_s16] sm:$0xff] %vm306_vm0, %v537_v15  ;;  %575 = vmatmul.bf16.gmra.mxu2 %v454_v29 }
 0x129   : > { %v538_v17 = vpop.f32.mrf.mxu1 }
 0x12a   : > { %v539_v50 = vadd.f32 %v1402_v10, %v538_v17 }
 0x12c   : > { %602 = vst.msk [vmem:[%s1406_s16 + $0x8] sm:$0xff] %vm306_vm0, %v539_v50 }
 0x131   : > { %v541_v18 = vpop.f32.mrf.mxu1 }
 0x132   : > { %v542_v19 = vadd.f32 %v1402_v10, %v541_v18 }
 0x134   : > { %603 = vst.msk [vmem:[%s1406_s16 + $0x10] sm:$0xff] %vm306_vm0, %v542_v19  ;;  %580 = vmatmul.bf16.gmra.mxu2 %v455_v43 }
 0x139   : > { %v543_v20 = vpop.f32.mrf.mxu1 }
 0x13a   : > { %v544_v21 = vadd.f32 %v1402_v10, %v543_v20 }
 0x13c   : > { %604 = vst.msk [vmem:[%s1406_s16 + $0x18] sm:$0xff] %vm306_vm0, %v544_v21 }
 0x141   : > { %v546_v22 = vpop.f32.mrf.mxu1 }
 0x142   : > { %v547_v23 = vadd.f32 %v1402_v10, %v546_v22 }
 0x144   : > { %605 = vst.msk [vmem:[%s1406_s16 + $0x20] sm:$0xff] %vm306_vm0, %v547_v23  ;;  %585 = vmatmul.bf16.gmra.mxu2 %v456_v58 }
 0x149   : > { %v548_v24 = vpop.f32.mrf.mxu1 }
 0x14a   : > { %v549_v25 = vadd.f32 %v1402_v10, %v548_v24 }
 0x14c   : > { %606 = vst.msk [vmem:[%s1406_s16 + $0x28] sm:$0xff] %vm306_vm0, %v549_v25 }
 0x151   : > { %v551_v26 = vpop.f32.mrf.mxu1 }
 0x152   : > { %v552_v27 = vadd.f32 %v1402_v10, %v551_v26 }
 0x154   : > { %607 = vst.msk [vmem:[%s1406_s16 + $0x30] sm:$0xff] %vm306_vm0, %v552_v27  ;;  %590 = vmatmul.bf16.gmra.mxu2 %v457_v8 }
 0x159   : > { %v553_v28 = vpop.f32.mrf.mxu1 }
 0x15a   : > { %v554_v29 = vadd.f32 %v1402_v10, %v553_v28 }
 0x15c   : > { %608 = vst.msk [vmem:[%s1406_s16 + $0x38] sm:$0xff] %vm306_vm0, %v554_v29 }
 0x161   : > { %v556_v30 = vpop.f32.mrf.mxu1 }
 0x162   : > { %v557_v31 = vadd.f32 %v1402_v10, %v556_v30 }
 0x164   : > { %609 = vst.msk [vmem:[%s1406_s16 + $0x40] sm:$0xff] %vm306_vm0, %v557_v31 }
 0x169   : > { %v558_v32 = vpop.f32.mrf.mxu1 }
 0x16a   : > { %v559_v33 = vadd.f32 %v1402_v10, %v558_v32 }
 0x16c   : > { %610 = vst.msk [vmem:[%s1406_s16 + $0x48] sm:$0xff] %vm306_vm0, %v559_v33 }
 0x16f   : > { %v596_v47 = vpop.f32.mrf.mxu3 }
 0x170   : > { %v597_v49 = vadd.f32 %v1402_v10, %v596_v47 }
 0x171   : > { %v561_v34 = vpop.f32.mrf.mxu1 }
 0x172   : > { %v562_v35 = vadd.f32 %v1402_v10, %v561_v34  ;;  %625 = vst.msk [vmem:[%s1406_s16 + $0xc0] sm:$0xff] %vm306_vm0, %v597_v49 }
 0x174   : > { %611 = vst.msk [vmem:[%s1406_s16 + $0x50] sm:$0xff] %vm306_vm0, %v562_v35 }
 0x177   : > { %v598_v52 = vpop.f32.mrf.mxu3 }
 0x178   : > { %v599_v54 = vadd.f32 %v1402_v10, %v598_v52 }
 0x179   : > { %v563_v36 = vpop.f32.mrf.mxu1 }
 0x17a   : > { %v564_v37 = vadd.f32 %v1402_v10, %v563_v36  ;;  %626 = vst.msk [vmem:[%s1406_s16 + $0xc8] sm:$0xff] %vm306_vm0, %v599_v54 }
 0x17c   : > { %612 = vst.msk [vmem:[%s1406_s16 + $0x58] sm:$0xff] %vm306_vm0, %v564_v37 }
 0x187   : > { %v566_v38 = vpop.f32.mrf.mxu2 }
 0x188   : > { %v567_v39 = vadd.f32 %v1402_v10, %v566_v38 }
 0x18a   : > { %613 = vst.msk [vmem:[%s1406_s16 + $0x60] sm:$0xff] %vm306_vm0, %v567_v39 }
 0x18f   : > { %v568_v40 = vpop.f32.mrf.mxu2 }
 0x190   : > { %v569_v41 = vadd.f32 %v1402_v10, %v568_v40 }
 0x192   : > { %614 = vst.msk [vmem:[%s1406_s16 + $0x68] sm:$0xff] %vm306_vm0, %v569_v41 }
 0x197   : > { %v571_v42 = vpop.f32.mrf.mxu2 }
 0x198   : > { %v572_v43 = vadd.f32 %v1402_v10, %v571_v42 }
 0x19a   : > { %615 = vst.msk [vmem:[%s1406_s16 + $0x70] sm:$0xff] %vm306_vm0, %v572_v43 }
 0x19f   : > { %v573_v44 = vpop.f32.mrf.mxu2 }
 0x1a0   : > { %v574_v45 = vadd.f32 %v1402_v10, %v573_v44 }
 0x1a2   : > { %616 = vst.msk [vmem:[%s1406_s16 + $0x78] sm:$0xff] %vm306_vm0, %v574_v45 }
 0x1a7   : > { %v576_v46 = vpop.f32.mrf.mxu2 }
 0x1a8   : > { %v577_v48 = vadd.f32 %v1402_v10, %v576_v46 }
 0x1aa   : > { %617 = vst.msk [vmem:[%s1406_s16 + $0x80] sm:$0xff] %vm306_vm0, %v577_v48 }
 0x1af   : > { %v578_v51 = vpop.f32.mrf.mxu2 }
 0x1b0   : > { %v579_v53 = vadd.f32 %v1402_v10, %v578_v51 }
 0x1b2   : > { %618 = vst.msk [vmem:[%s1406_s16 + $0x88] sm:$0xff] %vm306_vm0, %v579_v53 }
 0x1b7   : > { %v581_v55 = vpop.f32.mrf.mxu2 }
 0x1b8   : > { %v582_v56 = vadd.f32 %v1402_v10, %v581_v55 }
 0x1ba   : > { %619 = vst.msk [vmem:[%s1406_s16 + $0x90] sm:$0xff] %vm306_vm0, %v582_v56 }
 0x1bf   : > { %v583_v57 = vpop.f32.mrf.mxu2 }
 0x1c0   : > { %v584_v58 = vadd.f32 %v1402_v10, %v583_v57 }
 0x1c2   : > { %620 = vst.msk [vmem:[%s1406_s16 + $0x98] sm:$0xff] %vm306_vm0, %v584_v58 }
 0x1c7   : > { %v586_v59 = vpop.f32.mrf.mxu2 }
 0x1c8   : > { %v587_v60 = vadd.f32 %v1402_v10, %v586_v59 }
 0x1ca   : > { %621 = vst.msk [vmem:[%s1406_s16 + $0xa0] sm:$0xff] %vm306_vm0, %v587_v60 }
 0x1cf   : > { %v588_v61 = vpop.f32.mrf.mxu2 }
 0x1d0   : > { %v589_v62 = vadd.f32 %v1402_v10, %v588_v61 }
 0x1d2   : > { %622 = vst.msk [vmem:[%s1406_s16 + $0xa8] sm:$0xff] %vm306_vm0, %v589_v62 }
 0x1d7   : > { %v591_v63 = vpop.f32.mrf.mxu2 }
 0x1d8   : > { %v592_v0 = vadd.f32 %v1402_v10, %v591_v63 }
 0x1da   : > { %623 = vst.msk [vmem:[%s1406_s16 + $0xb0] sm:$0xff] %vm306_vm0, %v592_v0 }
 0x1de   : > { %633 = sbr.rel (!%p1285_p4) target bundleno = 556 (0x22c), region = 44 }
 0x1df   : > { %v593_v1 = vpop.f32.mrf.mxu2 }
 0x1e0   : > { %v594_v2 = vadd.f32 %v1402_v10, %v593_v1 }
 0x1e2   : > { %624 = vst.msk [vmem:[%s1406_s16 + $0xb8] sm:$0xff] %vm306_vm0, %v594_v2 }
 0x1e3   : > { %s1630_s18 = smov (!%p636_p8, %s635_s18), 26 }
 0x1e4   : > { %s1003_s27 = sshll.u32 %s1630_s18, 3 }
 0x1e5   : > { %p1006_p9 = scmp.eq.s32.totalorder %s1003_s27, 0 }
 0x1e6   : > { %1136 = sdivrem.u32 (!%p1006_p9), %s1630_s18, 26 }
 0x1e7   : > { %644 = sbr.rel (%p1006_p9) target bundleno = 556 (0x22c), region = 48 }
 0x1ef   : > { %s1498_s26 = spop.drf %1136 }
 0x1f0   : > { %s1138_s28 = spop.drf %1136  ;;  %p1007_p10 = scmp.le.s32.totalorder %s1498_s26, 0 }
 0x1f1   : > { %s1621_s21 = smov (!%p1007_p10), %s1492_s24  ;;  %s1622_s29 = smov (!%p1007_p10), %s1406_s16 }
 0x1f2   : > { %901 = sbr.rel (%p1007_p10) target bundleno = 530 (0x212), region = 124  ;;  %s1507_s30 = smov (!%p1007_p10), 0  }
 0x1f3   : > { %s1509_s6 = smov (!%p1007_p10), 0  }
 0x1f7 LB: >> { %v759_v3 = vld [vmem:[%s1204_s29] sm:$0xff]  ;;  %v761_v4 = vld [vmem:[%s1204_s29 + $0x8] sm:$0xff]  ;;  %v763_v5 = vld [vmem:[%s1204_s29 + $0x10] sm:$0xff]  ;;  %s811_s7 = sadd.s32 1, %s1208_s30  ;;  %s753_s6 = sadd.s32 1, %s1212_s6   ;;  %s1212_s6 = sphi %s1509_s6, %s753_s6   ;;  %s1208_s30 = sphi %s1507_s30, %s1625_s30   ;;  %s1204_s29 = sphi %s1622_s29, %s1624_s29   ;;  %s1200_s21 = sphi %s1621_s21, %s1623_s21  }
 0x1f8   : >> { %760 = vst [vmem:[%s1200_s21] sm:$0xff] %v759_v3  ;;  %v765_v6 = vld [vmem:[%s1204_s29 + $0x18] sm:$0xff]  ;;  %p812_p11 = scmp.ge.s32.totalorder %s811_s7, %s1498_s26  ;;  %v767_v7 = vld [vmem:[%s1204_s29 + $0x20] sm:$0xff]  ;;  %v769_v8 = vld [vmem:[%s1204_s29 + $0x28] sm:$0xff]  ;;  %p752_p12 = scmp.ge.s32.totalorder %s753_s6, %s1498_s26 }
 0x1f9   : >> { %762 = vst [vmem:[%s1200_s21 + $0x8] sm:$0xff] %v761_v4  ;;  %v771_v9 = vld [vmem:[%s1204_s29 + $0x30] sm:$0xff]  ;;  %v773_v10 = vld [vmem:[%s1204_s29 + $0x38] sm:$0xff]  ;;  %v775_v11 = vld [vmem:[%s1204_s29 + $0x40] sm:$0xff] }
 0x1fa   : >> { %764 = vst [vmem:[%s1200_s21 + $0x10] sm:$0xff] %v763_v5  ;;  %s1632_s7 = smov (%p812_p11, %s811_s7), 0  ;;  %v777_v12 = vld [vmem:[%s1204_s29 + $0x48] sm:$0xff]  ;;  %v779_v13 = vld [vmem:[%s1204_s29 + $0x50] sm:$0xff]  ;;  %v781_v14 = vld [vmem:[%s1204_s29 + $0x58] sm:$0xff] }
 0x1fb   : >> { %766 = vst [vmem:[%s1200_s21 + $0x18] sm:$0xff] %v765_v6  ;;  %s814_s8 = smul.u32 208, %s1632_s7  ;;  %v783_v15 = vld [vmem:[%s1204_s29 + $0x60] sm:$0xff]  ;;  %v785_v16 = vld [vmem:[%s1204_s29 + $0x68] sm:$0xff]  ;;  %v787_v17 = vld [vmem:[%s1204_s29 + $0x70] sm:$0xff]  ;;  %s1625_s30 = smov %s1632_s7 }
 0x1fc   : >> { %768 = vst [vmem:[%s1200_s21 + $0x20] sm:$0xff] %v767_v7  ;;  %v789_v50 = vld [vmem:[%s1204_s29 + $0x78] sm:$0xff]  ;;  %v791_v18 = vld [vmem:[%s1204_s29 + $0x80] sm:$0xff]  ;;  %v793_v19 = vld [vmem:[%s1204_s29 + $0x88] sm:$0xff] }
 0x1fd   : >> { %770 = vst [vmem:[%s1200_s21 + $0x28] sm:$0xff] %v769_v8  ;;  %s1543_s9 = scalar_lea.vmem %s1406_s16, %s814_s8 [#allocation2]   ;;  %s1546_s10 = scalar_lea.vmem %s1492_s24, %s814_s8   ;;  %v795_v20 = vld [vmem:[%s1204_s29 + $0x90] sm:$0xff]  ;;  %v797_v21 = vld [vmem:[%s1204_s29 + $0x98] sm:$0xff]  ;;  %v799_v22 = vld [vmem:[%s1204_s29 + $0xa0] sm:$0xff] }
 0x1fe   : >> { %772 = vst [vmem:[%s1200_s21 + $0x30] sm:$0xff] %v771_v9  ;;  %v801_v23 = vld [vmem:[%s1204_s29 + $0xa8] sm:$0xff]  ;;  %v803_v24 = vld [vmem:[%s1204_s29 + $0xb0] sm:$0xff]  ;;  %v805_v25 = vld [vmem:[%s1204_s29 + $0xb8] sm:$0xff] }
 0x1ff   : >> { %774 = vst [vmem:[%s1200_s21 + $0x38] sm:$0xff] %v773_v10  ;;  %v807_v26 = vld [vmem:[%s1204_s29 + $0xc0] sm:$0xff]  ;;  %v809_v27 = vld [vmem:[%s1204_s29 + $0xc8] sm:$0xff]  ;;  %s1624_s29 = smov %s1543_s9 }
 0x200   : >> { %776 = vst [vmem:[%s1200_s21 + $0x40] sm:$0xff] %v775_v11 }
 0x201   : >> { %778 = vst [vmem:[%s1200_s21 + $0x48] sm:$0xff] %v777_v12 }
 0x202   : >> { %780 = vst [vmem:[%s1200_s21 + $0x50] sm:$0xff] %v779_v13 }
 0x203   : >> { %782 = vst [vmem:[%s1200_s21 + $0x58] sm:$0xff] %v781_v14 }
 0x204   : >> { %784 = vst [vmem:[%s1200_s21 + $0x60] sm:$0xff] %v783_v15 }
 0x205   : >> { %786 = vst [vmem:[%s1200_s21 + $0x68] sm:$0xff] %v785_v16 }
 0x206   : >> { %788 = vst [vmem:[%s1200_s21 + $0x70] sm:$0xff] %v787_v17 }
 0x207   : >> { %790 = vst [vmem:[%s1200_s21 + $0x78] sm:$0xff] %v789_v50 }
 0x208   : >> { %792 = vst [vmem:[%s1200_s21 + $0x80] sm:$0xff] %v791_v18 }
 0x209   : >> { %794 = vst [vmem:[%s1200_s21 + $0x88] sm:$0xff] %v793_v19 }
 0x20a   : >> { %796 = vst [vmem:[%s1200_s21 + $0x90] sm:$0xff] %v795_v20 }
 0x20b   : >> { %798 = vst [vmem:[%s1200_s21 + $0x98] sm:$0xff] %v797_v21 }
 0x20c   : >> { %800 = vst [vmem:[%s1200_s21 + $0xa0] sm:$0xff] %v799_v22 }
 0x20d   : >> { %802 = vst [vmem:[%s1200_s21 + $0xa8] sm:$0xff] %v801_v23  ;;  %755 = sbr.rel (!%p752_p12) target bundleno = 503 (0x1f7), region = 130 }
 0x20e   : >> { %804 = vst [vmem:[%s1200_s21 + $0xb0] sm:$0xff] %v803_v24 }
 0x20f   : >> { %806 = vst [vmem:[%s1200_s21 + $0xb8] sm:$0xff] %v805_v25 }
 0x210   : >> { %808 = vst [vmem:[%s1200_s21 + $0xc0] sm:$0xff] %v807_v26 }
 0x211   : >> { %810 = vst [vmem:[%s1200_s21 + $0xc8] sm:$0xff] %v809_v27  ;;  %s1623_s21 = smov %s1546_s10 }
 0x212 PF: > { %1139 = sdivrem.u32 %s1630_s18, 26 }
 0x213   : > { %s1008_s12 = smul.u32 208, %s1498_s26 }
 0x215   : > { %s1599_s11 = scalar_lea.vmem %s1406_s16, %s1008_s12 [#allocation2]   ;;  %s824_s13 = scalar_lea.vmem %s1492_s24, %s1008_s12  }
 0x21b   : > { %s1140_s14 = spop.drf %1139 }
 0x21c   : > { %s1141_s15 = spop.drf %1139 }
 0x21d   : > { %p1010_p13 = scmp.le.s32.totalorder %s1141_s15, 0 }
 0x21e   : > { %s1214_s17 = smov (!%p1010_p13), %s824_s13   ;;  %s1218_s20 = smov (!%p1010_p13), %s1599_s11  }
 0x21f   : > { %915 = sbr.rel (%p1010_p13) target bundleno = 556 (0x22c), region = 135  ;;  %s1222_s23 = smov (!%p1010_p13), 0  }
 0x220   : > { %s1226_s27 = smov (!%p1010_p13), 0  }
 0x224 LB: >> { %v834_v28 = vld [vmem:[%s1220_s20] sm:$0xff]  ;;  %s836_s16 = sadd.s32 1, %s1224_s23  ;;  %s828_s27 = sadd.s32 1, %s1228_s27   ;;  %s1228_s27 = sphi %s1226_s27, %s828_s27   ;;  %s1224_s23 = sphi %s1222_s23, %s1223_s23   ;;  %s1220_s20 = sphi %s1218_s20, %s841_s20   ;;  %s1216_s17 = sphi %s1214_s17, %s842_s17  }
 0x225   : >> { %835 = vst [vmem:[%s1216_s17] sm:$0xff] %v834_v28  ;;  %p837_p0 = scmp.ge.s32.totalorder %s836_s16, %s1141_s15  ;;  %p827_p1 = scmp.ge.s32.totalorder %s828_s27, %s1141_s15 }
 0x227   : >> { %s1634_s16 = smov (%p837_p0, %s836_s16), 0  ;;  %830 = sbr.rel (!%p827_p1) target bundleno = 548 (0x224), region = 141 }
 0x228   : >> { %s1011_s18 = sshll.u32 %s1634_s16, 3  ;;  %s1223_s23 = smov %s1634_s16  }
 0x229   : >> { %s841_s20 = scalar_lea.vmem %s1599_s11, %s1011_s18 [#allocation2]   ;;  %s842_s17 = scalar_lea.vmem %s824_s13, %s1011_s18  }
 0x22c PF: > { %p12_p2 = scmp.ge.s32.totalorder %s1275_s22, 4   ;;  %s1626_s18 = smov %s1192_s19 }
 0x22d   : > { %s1627_s19 = smov %s1283_s25  ;;  %s1628_s20 = smov %s1275_s22 }
 0x22e   :  { %14 = sbr.rel (!%p12_p2) target bundleno = 2 (0x2), region = 152 }

</bundles_post_ra>
